<compile_context>
chip_gen: v7x
topology: tpu7x:2x2x1
jax: 0.10.0
libtpu: 0.0.40
codegen_flags: <defaults>
</compile_context>

<pallas_src>
import functools

import numpy as np
import jax
import jax.numpy as jnp
from jax import lax
from jax.experimental import pallas as pl
from jax.experimental.pallas import tpu as pltpu


_KRON_MAX_HW = 1024  # use the single-matmul (Kronecker) path when H*W <= this


def _round_up(n, m):
    return ((n + m - 1) // m) * m


def _axis_weights(n, filter_size):
    """ifftshift-ed 1-D box mask (natural FFT ordering), float64."""
    c = n // 2
    idx = np.arange(n, dtype=np.float64)
    m = ((idx >= c - filter_size) & (idx <= c + filter_size)).astype(np.float64)
    return np.fft.ifftshift(m)


def _dft(n):
    k = np.arange(n)
    return np.exp(-2j * np.pi * np.outer(k, k) / n)


def _axis_ops(h, w, filter_size):
    """Real left (H,H) and right (W,W) operators (imag parts ~1e-16 roundoff)."""
    dy = _axis_weights(h, filter_size)
    dx = _axis_weights(w, filter_size)
    FH = _dft(h)
    FW = _dft(w)
    A = (np.conj(FH) @ (dy[:, None] * FH)) / h      # (H, H), real-valued
    Bm = ((FW * dx[None, :]) @ np.conj(FW)) / w     # (W, W), real-valued
    return A.real, Bm.real


@functools.lru_cache(maxsize=None)
def _separable_ops(h, w, filter_size, g):
    A, Bm = _axis_ops(h, w, filter_size)
    Bbd = np.kron(np.eye(g), Bm)                    # (g*W, g*W) block-diagonal
    return jnp.asarray(A, jnp.float32), jnp.asarray(Bbd, jnp.float32)


@functools.lru_cache(maxsize=None)
def _kron_op(h, w, filter_size):
    A, Bm = _axis_ops(h, w, filter_size)
    # y_flat = x_flat @ M  with  M = A^T (x) B  (row-major flattening of (H,W)).
    M = np.kron(A.T, Bm)                            # (H*W, H*W)
    return jnp.asarray(M, jnp.float32)


# ----------------------------------------------------------------------------
# Kernels
# ----------------------------------------------------------------------------
def _kron_kernel(x_ref, m_ref, o_ref, *, clamp):
    # One lane-dense matmul: (TB, HW) @ (HW, HW).
    y = jnp.dot(x_ref[...].astype(jnp.float32), m_ref[...],
                preferred_element_type=jnp.float32)
    if clamp:
        y = jnp.clip(y, 0.0, 1.0)
    o_ref[...] = y.astype(o_ref.dtype)


def _separable_kernel(x_ref, a_ref, b_ref, o_ref, *, clamp):
    TB, H, GW = x_ref.shape
    x = x_ref[...].astype(jnp.float32)              # (TB, H, GW)

    # Left multiply: per-slab A @ x[t] as a batched matmul (result already in
    # (TB, H, GW) order -> no in-kernel transpose).
    a_b = jnp.broadcast_to(a_ref[...][None, :, :], (TB, H, H))
    t1 = lax.dot_general(
        a_b, x,
        dimension_numbers=(((2,), (1,)), ((0,), (0,))),
        preferred_element_type=jnp.float32)          # (TB, H, GW)

    # Right multiply: one lane-dense matmul over all stacked rows.
    y = jnp.dot(t1.reshape(TB * H, GW), b_ref[...],
                preferred_element_type=jnp.float32).reshape(TB, H, GW)
    if clamp:
        y = jnp.clip(y, 0.0, 1.0)
    o_ref[...] = y.astype(o_ref.dtype)


# ----------------------------------------------------------------------------
# Wrappers
# ----------------------------------------------------------------------------
def _lowpass_kron(x, filter_size):
    B, C, H, W = x.shape
    N = B * C
    HW = H * W
    M = _kron_op(H, W, filter_size)

    TB = min(256, _round_up(N, 8))                  # rows per grid step
    Npad = _round_up(N, TB)
    num_steps = Npad // TB

    xf = x.reshape(N, HW)                           # free (bitcast) reshape
    if Npad != N:
        xf = jnp.pad(xf, ((0, Npad - N), (0, 0)))

    clamp = (x.dtype == jnp.float32)
    kernel = functools.partial(_kron_kernel, clamp=clamp)

    tile_bytes = TB * HW * 4
    op_bytes = HW * HW * 4
    needed = 4 * tile_bytes + 2 * op_bytes + (2 << 20)
    vmem_limit = int(min(max(needed, 16 << 20), 48 << 20))

    out = pl.pallas_call(
        kernel,
        out_shape=jax.ShapeDtypeStruct((Npad, HW), x.dtype),
        grid_spec=pltpu.PrefetchScalarGridSpec(
            num_scalar_prefetch=0,
            grid=(num_steps,),
            in_specs=[
                pl.BlockSpec((TB, HW), lambda i: (i, 0)),
                # Grid-invariant operator: constant index_map -> DMA'd once.
                pl.BlockSpec((HW, HW), lambda i: (0, 0)),
            ],
            out_specs=pl.BlockSpec((TB, HW), lambda i: (i, 0)),
        ),
        compiler_params=pltpu.CompilerParams(
            dimension_semantics=("parallel",),
            vmem_limit_bytes=vmem_limit),
    )(xf, M)

    return out[:N].reshape(B, C, H, W)


def _lowpass_separable(x, filter_size):
    B, C, H, W = x.shape
    N = B * C

    # Lane packing: G images side-by-side along the last (lane) axis.
    G = max(1, 128 // W) if W < 128 else 1
    # Slab batching: TB (H, G*W) slabs per grid step.
    TB = min(max(1, 256 // H), pl.cdiv(N, G))
    num_steps = pl.cdiv(N, G * TB)
    S = num_steps * TB
    Npad = S * G
    GW = G * W

    ar, bbd = _separable_ops(H, W, filter_size, G)

    xf = x.reshape(N, H, W)
    if Npad != N:
        xf = jnp.pad(xf, ((0, Npad - N), (0, 0), (0, 0)))
    # packed[s, h, g*W + w] = image[s*G + g, h, w]
    xp = xf.reshape(S, G, H, W).transpose(0, 2, 1, 3).reshape(S, H, GW)

    clamp = (x.dtype == jnp.float32)
    kernel = functools.partial(_separable_kernel, clamp=clamp)

    tile_bytes = TB * H * GW * 4
    op_bytes = (H * H + GW * GW) * 4
    needed = 4 * tile_bytes + 2 * op_bytes + (2 << 20)
    vmem_limit = int(min(max(needed, 16 << 20), 48 << 20))

    out = pl.pallas_call(
        kernel,
        out_shape=jax.ShapeDtypeStruct((S, H, GW), x.dtype),
        grid_spec=pltpu.PrefetchScalarGridSpec(
            num_scalar_prefetch=0,
            grid=(num_steps,),
            in_specs=[
                pl.BlockSpec((TB, H, GW), lambda i: (i, 0, 0)),
                # Grid-invariant operators: constant index_map -> DMA'd once.
                pl.BlockSpec((H, H), lambda i: (0, 0)),
                pl.BlockSpec((GW, GW), lambda i: (0, 0)),
            ],
            out_specs=pl.BlockSpec((TB, H, GW), lambda i: (i, 0, 0)),
        ),
        compiler_params=pltpu.CompilerParams(
            dimension_semantics=("parallel",),
            vmem_limit_bytes=vmem_limit),
    )(xp, ar, bbd)

    out = (out.reshape(S, H, G, W).transpose(0, 2, 1, 3)
              .reshape(Npad, H, W)[:N].reshape(B, C, H, W))
    return out


def batch_low_pass_filter(x, filter_size=30):
    """x: [B, C, H, W] (NCHW).  Returns filtered tensor of same shape/dtype."""
    _, _, H, W = x.shape
    if H * W <= _KRON_MAX_HW:
        return _lowpass_kron(x, filter_size)
    return _lowpass_separable(x, filter_size)


# ----------------------------------------------------------------------------
# Pure-JAX reference mirroring the torch forward exactly (float32 path).
# ----------------------------------------------------------------------------
def _reference(x, filter_size):
    B, C, H, W = x.shape
    cy, cx = H // 2, W // 2
    y = jnp.arange(H)
    xx = jnp.arange(W)
    my = (y >= cy - filter_size) & (y <= cy + filter_size)
    mx = (xx >= cx - filter_size) & (xx <= cx + filter_size)
    mask = (my[:, None] & mx[None, :]).astype(jnp.float32)
    xf = jnp.fft.fft2(x, norm="ortho")
    xf = jnp.fft.fftshift(xf, axes=(-2, -1))
    xf = xf * mask[None, None, ...]
    xf = jnp.fft.ifftshift(xf, axes=(-2, -1))
    out = jnp.fft.ifft2(xf, norm="ortho").real
    return jnp.clip(out, 0.0, 1.0).astype(x.dtype)


if __name__ == "__main__":
    key = jax.random.PRNGKey(0)

    # 1) Primary small case (Kronecker single-matmul path), as per the module.
    x1 = jax.random.uniform(key, (2, 4, 16, 16), dtype=jnp.float32)
    out1 = jax.block_until_ready(batch_low_pass_filter(x1, filter_size=3))
    ref1 = _reference(x1, 3)
    assert out1.shape == x1.shape and out1.dtype == x1.dtype
    np.testing.assert_allclose(np.asarray(out1), np.asarray(ref1),
                               atol=2e-4, rtol=2e-4)

    # 2) Larger image, W >= 128 (separable path, no lane packing).
    x2 = jax.random.uniform(jax.random.PRNGKey(1), (1, 2, 160, 144),
                            dtype=jnp.float32)
    out2 = jax.block_until_ready(batch_low_pass_filter(x2, filter_size=30))
    ref2 = _reference(x2, 30)
    np.testing.assert_allclose(np.asarray(out2), np.asarray(ref2),
                               atol=1e-3, rtol=1e-3)

    # 3) Tall narrow image, W < 128 (separable path with lane packing).
    x3 = jax.random.uniform(jax.random.PRNGKey(2), (2, 2, 128, 16),
                            dtype=jnp.float32)
    out3 = jax.block_until_ready(batch_low_pass_filter(x3, filter_size=3))
    ref3 = _reference(x3, 3)
    np.testing.assert_allclose(np.asarray(out3), np.asarray(ref3),
                               atol=1e-3, rtol=1e-3)

    print("KERNEL_OK")
</pallas_src>

<mosaic_0001>
module attributes {stable_mosaic.version = 11 : i64} {
  func.func @_kron_kernel(%arg0: i32, %arg1: memref<8x256xf32, #tpu.memory_space<vmem>>, %arg2: memref<256x256xf32, #tpu.memory_space<vmem>>, %arg3: memref<8x256xf32, #tpu.memory_space<vmem>>) attributes {dimension_semantics = [#tpu.dimension_semantics<parallel>], iteration_bounds = array<i64: 1>, scalar_prefetch = 0 : i64, scratch_operands = 0 : i64, tpu.core_type = #tpu.core_type<tc>, window_params = [{transform_indices = @transform_0, window_bounds = array<i64: 8, 256>}, {pipeline_mode = #tpu.pipeline_mode<synchronous>, transform_indices = @transform_1, window_bounds = array<i64: 256, 256>}, {transform_indices = @transform_2, window_bounds = array<i64: 8, 256>}]} {
    %c0 = arith.constant 0 : index
    %c0_0 = arith.constant 0 : index
    %0 = vector.load %arg1[%c0, %c0_0] : memref<8x256xf32, #tpu.memory_space<vmem>>, vector<8x256xf32>
    %c0_1 = arith.constant 0 : index
    %c0_2 = arith.constant 0 : index
    %1 = vector.load %arg2[%c0_1, %c0_2] : memref<256x256xf32, #tpu.memory_space<vmem>>, vector<256x256xf32>
    %cst = arith.constant dense<0.000000e+00> : vector<8x256xf32>
    %2 = tpu.matmul %0, %1, %cst {dimension_numbers = #tpu.dot_dimension_numbers<[1], [0], [0], [1], [0, 0, 1, 1], [], []>} : vector<8x256xf32>, vector<256x256xf32>, vector<8x256xf32> -> vector<8x256xf32>
    %cst_3 = arith.constant 0.000000e+00 : f32
    %cst_4 = arith.constant 1.000000e+00 : f32
    %3 = vector.broadcast %cst_3 : f32 to vector<8x256xf32>
    %4 = arith.maximumf %3, %2 : vector<8x256xf32>
    %5 = vector.broadcast %cst_4 : f32 to vector<8x256xf32>
    %6 = arith.minimumf %5, %4 : vector<8x256xf32>
    %c0_5 = arith.constant 0 : index
    %c0_6 = arith.constant 0 : index
    %7 = vector.load %arg3[%c0_5, %c0_6] : memref<8x256xf32, #tpu.memory_space<vmem>>, vector<8x256xf32>
    tpu.vector_store %arg3[%c0_5, %c0_6], %6 {strides = array<i32>} : memref<8x256xf32, #tpu.memory_space<vmem>>, vector<8x256xf32>,
    return
  }
  func.func @transform_0(%arg0: i32) -> (i32, i32) {
    %c0_i32 = arith.constant 0 : i32
    %c0_i32_0 = arith.constant 0 : i32
    return %arg0, %c0_i32 : i32, i32
  }
  func.func @transform_1(%arg0: i32) -> (i32, i32) {
    %c0_i32 = arith.constant 0 : i32
    %c0_i32_0 = arith.constant 0 : i32
    %c0_i32_1 = arith.constant 0 : i32
    return %c0_i32, %c0_i32_0 : i32, i32
  }
  func.func @transform_2(%arg0: i32) -> (i32, i32) {
    %c0_i32 = arith.constant 0 : i32
    %c0_i32_0 = arith.constant 0 : i32
    return %arg0, %c0_i32 : i32, i32
  }
}

</mosaic_0001>

<bundles_post_ra>
// kernel: tpu_custom_call.1
= control target key start
LH: loop header
LB: loop body
LE: loop exit
PB: predicated region body
PF: predicated region fallthrough
CT: control target
= control target key end

     0   :  { %7 = vsyncpa [#allocation3], 0  ;;  %s401_s0 = inlined_call_operand.hbm [shape: f32[8,256], index: 0, kind: input, shape index: {}]   ;;  %s402_s1 = inlined_call_operand.hbm [shape: f32[256,256], index: 1, kind: input, shape index: {}]   ;;  %s403_s2 = inlined_call_operand.hbm [shape: f32[8,256], index: 2, kind: output, shape index: {}]  }
   0x1   :  { %8 = vsyncpa [#allocation6], 0 }
   0x2   :  { %9 = vsyncpa [#allocation4], 0  ;;  %s338_s9 = smov [#allocation2]   ;;  %s339_s11 = smov [#allocation5]  }
   0x3   :  { %s16_s10 = sshll.u32 %s338_s9, 4  ;;  %s25_s12 = sshll.u32 %s339_s11, 4  ;;  %s17_s10 = int_to_ptr.vmem [resolvable:$true] %s16_s10  ;;  %s358_s12 = int_to_ptr.vmem [resolvable:$true] %s25_s12 }
   0x4   :  { %s266_s15 = scalar_lea.hbm %s401_s0, 256 }
   0x5   :  { %p267_p0 = scmp.ne.s32.totalorder %s401_s0, %s266_s15  ;;  %p270_p1 = scmp.lt.u32.totalorder %s266_s15, %s401_s0 }
   0x7   :  { %p272_p2 = pnand %p270_p1, %p267_p0 }
   0x9   :  { %275 = shalt.err (!%p272_p2)
}
   0xa   :  { %s276_s20 = scalar_lea.vmem %s17_s10, 256  ;;  %p281_p4 = scmp.lt.s32.totalorder %s17_s10, %s17_s10 }
   0xb   :  { %p277_p3 = scmp.ne.s32.totalorder %s17_s10, %s276_s20  ;;  %p282_p5 = scmp.lt.s32.totalorder %s276_s20, %s276_s20 }
   0xd   :  { %p283_p6 = por %p282_p5, %p281_p4 }
   0xf   :  { %p284_p7 = pnand %p283_p6, %p277_p3 }
  0x11   :  { %287 = shalt.err (!%p284_p7)
}
  0x12   :  { %19 = dma.hbm_to_vmem [thread:$0]  %s401_s0, 256, %s17_s10, [#allocation3]  }
  0x13   :  { %s288_s25 = scalar_lea.hbm %s402_s1, 8192 }
  0x14   :  { %p289_p8 = scmp.ne.s32.totalorder %s402_s1, %s288_s25  ;;  %p292_p9 = scmp.lt.u32.totalorder %s288_s25, %s402_s1 }
  0x16   :  { %p294_p10 = pnand %p292_p9, %p289_p8 }
  0x18   :  { %297 = shalt.err (!%p294_p10)
}
  0x19   :  { %s298_s30 = scalar_lea.vmem %s358_s12, 8192  ;;  %p303_p12 = scmp.lt.s32.totalorder %s358_s12, %s358_s12 }
  0x1a   :  { %p299_p11 = scmp.ne.s32.totalorder %s358_s12, %s298_s30  ;;  %p304_p13 = scmp.lt.s32.totalorder %s298_s30, %s298_s30 }
  0x1c   :  { %p305_p0 = por %p304_p13, %p303_p12 }
  0x1e   :  { %p306_p1 = pnand %p305_p0, %p299_p11 }
  0x20   :  { %309 = shalt.err (!%p306_p1)
}
  0x21   :  { %s340_s0 = smov 256   ;;  %s341_s3 = smov 16  }
  0x22   :  { %31 = dma.hbm_to_vmem [thread:$0]  %s402_s1, 8192, %s358_s12, [#allocation6], %s340_s0, %s340_s0, %s341_s3  }
  0x23   :  { %332 = dma.done.wait [#allocation3], 256  }
  0x24   :  { %333 = vsyncadd [#allocation3], 4294967040 }
  0x25   :  { %334 = dma.done.wait [#allocation6], 8192  }
  0x26   :  { %335 = vsyncadd [#allocation6], 4294959104  ;;  %v41_v0 = vld [vmem:[#allocation5 + $0x8] sm:$0xff]  ;;  %v43_v1 = vld [vmem:[#allocation5 + $0x18] sm:$0xff]  ;;  %s342_s1 = smov [#allocation7]  }
  0x27   :  { %v40_v2 = vld [vmem:[#allocation5] sm:$0xff]  ;;  %v197_v3 = vpack.c.bf16 %v43_v1, %v41_v0  ;;  %v42_v4 = vld [vmem:[#allocation5 + $0x10] sm:$0xff]  ;;  %v45_v5 = vld [vmem:[#allocation5 + $0x28] sm:$0xff]  ;;  %s187_s6 = sshll.u32 %s342_s1, 4  ;;  %s188_s6 = int_to_ptr.vmem [resolvable:$true] %s187_s6 }
  0x28   :  { %v47_v6 = vld [vmem:[#allocation5 + $0x38] sm:$0xff]  ;;  %v199_v7 = vpack.c.bf16 %v42_v4, %v40_v2  ;;  %v44_v9 = vld [vmem:[#allocation5 + $0x20] sm:$0xff]  ;;  %v46_v10 = vld [vmem:[#allocation5 + $0x30] sm:$0xff]  ;;  %s310_s7 = scalar_lea.vmem %s188_s6, 256  ;;  %p315_p3 = scmp.lt.s32.totalorder %s188_s6, %s188_s6 }
  0x29   :  { %v201_v8 = vpack.c.bf16 %v47_v6, %v45_v5  ;;  %v49_v11 = vld [vmem:[#allocation5 + $0x48] sm:$0xff]  ;;  %198 = vmatprep.subr.bf16.mxu0 %v197_v3  ;;  %v51_v12 = vld [vmem:[#allocation5 + $0x58] sm:$0xff]  ;;  %v203_v13 = vpack.c.bf16 %v46_v10, %v44_v9  ;;  %v48_v15 = vld [vmem:[#allocation5 + $0x40] sm:$0xff]  ;;  %p311_p2 = scmp.ne.s32.totalorder %s188_s6, %s310_s7  ;;  %p316_p4 = scmp.lt.s32.totalorder %s310_s7, %s310_s7 }
  0x2a   :  { %200 = vmatpush1.bf16.msra.mxu0 %v199_v7  ;;  %v205_v14 = vpack.c.bf16 %v51_v12, %v49_v11  ;;  %v50_v16 = vld [vmem:[#allocation5 + $0x50] sm:$0xff]  ;;  %v53_v17 = vld [vmem:[#allocation5 + $0x68] sm:$0xff]  ;;  %v55_v18 = vld [vmem:[#allocation5 + $0x78] sm:$0xff] }
  0x2b   :  { %202 = vmatprep.subr.bf16.mxu0 %v201_v8  ;;  %v207_v19 = vpack.c.bf16 %v50_v16, %v48_v15  ;;  %v209_v20 = vpack.c.bf16 %v55_v18, %v53_v17  ;;  %v52_v21 = vld [vmem:[#allocation5 + $0x60] sm:$0xff]  ;;  %v54_v22 = vld [vmem:[#allocation5 + $0x70] sm:$0xff]  ;;  %v57_v23 = vld [vmem:[#allocation5 + $0x88] sm:$0xff]  ;;  %p317_p5 = por %p316_p4, %p315_p3 }
  0x2c   :  { %v59_v24 = vld [vmem:[#allocation5 + $0x98] sm:$0xff]  ;;  %v211_v25 = vpack.c.bf16 %v54_v22, %v52_v21  ;;  %v56_v27 = vld [vmem:[#allocation5 + $0x80] sm:$0xff]  ;;  %v58_v28 = vld [vmem:[#allocation5 + $0x90] sm:$0xff] }
  0x2d   :  { %v213_v26 = vpack.c.bf16 %v59_v24, %v57_v23  ;;  %v61_v29 = vld [vmem:[#allocation5 + $0xa8] sm:$0xff]  ;;  %v63_v30 = vld [vmem:[#allocation5 + $0xb8] sm:$0xff]  ;;  %v215_v31 = vpack.c.bf16 %v58_v28, %v56_v27  ;;  %v60_v33 = vld [vmem:[#allocation5 + $0xa0] sm:$0xff]  ;;  %p318_p6 = pnand %p317_p5, %p311_p2 }
  0x2e   :  { %204 = vmatpush1.bf16.msra.mxu0 %v203_v13  ;;  %v217_v32 = vpack.c.bf16 %v63_v30, %v61_v29  ;;  %v62_v34 = vld [vmem:[#allocation5 + $0xb0] sm:$0xff]  ;;  %v65_v35 = vld [vmem:[#allocation5 + $0xc8] sm:$0xff]  ;;  %v67_v36 = vld [vmem:[#allocation5 + $0xd8] sm:$0xff] }
  0x2f   :  { %206 = vmatprep.subr.bf16.mxu0 %v205_v14  ;;  %v219_v37 = vpack.c.bf16 %v62_v34, %v60_v33  ;;  %v221_v38 = vpack.c.bf16 %v67_v36, %v65_v35  ;;  %v64_v39 = vld [vmem:[#allocation5 + $0xc0] sm:$0xff]  ;;  %v66_v40 = vld [vmem:[#allocation5 + $0xd0] sm:$0xff]  ;;  %v39_v41 = vld [vmem:[#allocation2 + $0x8] sm:$0xff] }
  0x30   :  { %v69_v42 = vld [vmem:[#allocation5 + $0xe8] sm:$0xff]  ;;  %v71_v43 = vld [vmem:[#allocation5 + $0xf8] sm:$0xff]  ;;  %168 = vmatprep.mubr.f32.mxu0 %v39_v41  ;;  %v223_v44 = vpack.c.bf16 %v66_v40, %v64_v39  ;;  %v68_v46 = vld [vmem:[#allocation5 + $0xe0] sm:$0xff] }
  0x31   :  { %v225_v45 = vpack.c.bf16 %v71_v43, %v69_v42  ;;  %v70_v47 = vld [vmem:[#allocation5 + $0xf0] sm:$0xff]  ;;  %v73_v48 = vld [vmem:[#allocation5 + $0x108] sm:$0xff]  ;;  %v75_v49 = vld [vmem:[#allocation5 + $0x118] sm:$0xff] }
  0x32   :  { %208 = vmatpush1.bf16.msra.mxu0 %v207_v19  ;;  %v227_v50 = vpack.c.bf16 %v70_v47, %v68_v46  ;;  %v229_v51 = vpack.c.bf16 %v75_v49, %v73_v48  ;;  %v72_v52 = vld [vmem:[#allocation5 + $0x100] sm:$0xff]  ;;  %v74_v53 = vld [vmem:[#allocation5 + $0x110] sm:$0xff]  ;;  %v77_v54 = vld [vmem:[#allocation5 + $0x128] sm:$0xff] }
  0x33   :  { %210 = vmatprep.subr.bf16.mxu0 %v209_v20  ;;  %v79_v55 = vld [vmem:[#allocation5 + $0x138] sm:$0xff]  ;;  %v231_v56 = vpack.c.bf16 %v74_v53, %v72_v52  ;;  %v76_v58 = vld [vmem:[#allocation5 + $0x120] sm:$0xff]  ;;  %v78_v59 = vld [vmem:[#allocation5 + $0x130] sm:$0xff] }
  0x34   :  { %v233_v57 = vpack.c.bf16 %v79_v55, %v77_v54  ;;  %v81_v60 = vld [vmem:[#allocation5 + $0x148] sm:$0xff]  ;;  %v83_v61 = vld [vmem:[#allocation5 + $0x158] sm:$0xff]  ;;  %v235_v62 = vpack.c.bf16 %v78_v59, %v76_v58  ;;  %v80_v0 = vld [vmem:[#allocation5 + $0x140] sm:$0xff] }
  0x35   :  { %v237_v63 = vpack.c.bf16 %v83_v61, %v81_v60  ;;  %v82_v1 = vld [vmem:[#allocation5 + $0x150] sm:$0xff]  ;;  %v85_v2 = vld [vmem:[#allocation5 + $0x168] sm:$0xff]  ;;  %v87_v3 = vld [vmem:[#allocation5 + $0x178] sm:$0xff] }
  0x36   :  { %212 = vmatpush1.bf16.msra.mxu0 %v211_v25  ;;  %v239_v4 = vpack.c.bf16 %v82_v1, %v80_v0  ;;  %v241_v5 = vpack.c.bf16 %v87_v3, %v85_v2  ;;  %v84_v6 = vld [vmem:[#allocation5 + $0x160] sm:$0xff]  ;;  %v86_v7 = vld [vmem:[#allocation5 + $0x170] sm:$0xff]  ;;  %v89_v8 = vld [vmem:[#allocation5 + $0x188] sm:$0xff] }
  0x37   :  { %214 = vmatprep.subr.bf16.mxu0 %v213_v26  ;;  %v91_v9 = vld [vmem:[#allocation5 + $0x198] sm:$0xff]  ;;  %v243_v10 = vpack.c.bf16 %v86_v7, %v84_v6  ;;  %v88_v12 = vld [vmem:[#allocation5 + $0x180] sm:$0xff]  ;;  %v90_v13 = vld [vmem:[#allocation5 + $0x190] sm:$0xff] }
  0x38   :  { %v245_v11 = vpack.c.bf16 %v91_v9, %v89_v8  ;;  %v93_v14 = vld [vmem:[#allocation5 + $0x1a8] sm:$0xff]  ;;  %v95_v15 = vld [vmem:[#allocation5 + $0x1b8] sm:$0xff]  ;;  %v247_v16 = vpack.c.bf16 %v90_v13, %v88_v12  ;;  %v92_v18 = vld [vmem:[#allocation5 + $0x1a0] sm:$0xff] }
  0x39   :  { %v249_v17 = vpack.c.bf16 %v95_v15, %v93_v14  ;;  %v94_v19 = vld [vmem:[#allocation5 + $0x1b0] sm:$0xff]  ;;  %v97_v20 = vld [vmem:[#allocation5 + $0x1c8] sm:$0xff]  ;;  %v99_v21 = vld [vmem:[#allocation5 + $0x1d8] sm:$0xff] }
  0x3a   :  { %216 = vmatpush1.bf16.msra.mxu0 %v215_v31  ;;  %v251_v22 = vpack.c.bf16 %v94_v19, %v92_v18  ;;  %v253_v23 = vpack.c.bf16 %v99_v21, %v97_v20  ;;  %v96_v24 = vld [vmem:[#allocation5 + $0x1c0] sm:$0xff]  ;;  %v98_v25 = vld [vmem:[#allocation5 + $0x1d0] sm:$0xff]  ;;  %v101_v26 = vld [vmem:[#allocation5 + $0x1e8] sm:$0xff] }
  0x3b   :  { %218 = vmatprep.subr.bf16.mxu0 %v217_v32  ;;  %v103_v27 = vld [vmem:[#allocation5 + $0x1f8] sm:$0xff]  ;;  %v255_v28 = vpack.c.bf16 %v98_v25, %v96_v24  ;;  %v100_v30 = vld [vmem:[#allocation5 + $0x1e0] sm:$0xff]  ;;  %v102_v31 = vld [vmem:[#allocation5 + $0x1f0] sm:$0xff] }
  0x3c   :  { %v257_v29 = vpack.c.bf16 %v103_v27, %v101_v26  ;;  %v259_v32 = vpack.c.bf16 %v102_v31, %v100_v30  ;;  %v38_v33 = vld [vmem:[#allocation2] sm:$0xff] }
  0x3e   :  { %220 = vmatpush1.bf16.msra.mxu0 %v219_v37 }
  0x3f   :  { %222 = vmatprep.subr.bf16.mxu0 %v221_v38 }
  0x42   :  { %224 = vmatpush1.bf16.msra.mxu0 %v223_v44 }
  0x43   :  { %226 = vmatprep.subr.bf16.mxu0 %v225_v45 }
  0x46   :  { %228 = vmatpush1.bf16.msra.mxu0 %v227_v50 }
  0x47   :  { %230 = vmatprep.subr.bf16.mxu0 %v229_v51 }
  0x4a   :  { %232 = vmatpush1.bf16.msra.mxu0 %v231_v56 }
  0x4b   :  { %234 = vmatprep.subr.bf16.mxu0 %v233_v57 }
  0x4e   :  { %236 = vmatpush1.bf16.msra.mxu0 %v235_v62 }
  0x4f   :  { %238 = vmatprep.subr.bf16.mxu0 %v237_v63 }
  0x52   :  { %240 = vmatpush1.bf16.msra.mxu0 %v239_v4 }
  0x53   :  { %242 = vmatprep.subr.bf16.mxu0 %v241_v5 }
  0x56   :  { %244 = vmatpush1.bf16.msra.mxu0 %v243_v10 }
  0x57   :  { %246 = vmatprep.subr.bf16.mxu0 %v245_v11 }
  0x5a   :  { %248 = vmatpush1.bf16.msra.mxu0 %v247_v16 }
  0x5b   :  { %250 = vmatprep.subr.bf16.mxu0 %v249_v17 }
  0x5e   :  { %252 = vmatpush1.bf16.msra.mxu0 %v251_v22 }
  0x5f   :  { %254 = vmatprep.subr.bf16.mxu0 %v253_v23 }
  0x62   :  { %256 = vmatpush1.bf16.msra.mxu0 %v255_v28 }
  0x63   :  { %258 = vmatprep.subr.bf16.mxu0 %v257_v29 }
  0x66   :  { %260 = vmatpush1.bf16.msra.mxu0 %v259_v32 }
  0x69   :  { %169 = vmatmul.mubr.f32.vlgmr.msra.gmra.mrb[0].mxu0 %v38_v33 }
 0x13c   :  { %v170_v34 = vpop.f32.mrb[0].mxu0 }
 0x13d   :  { %v175_v35 = vmax.f32 %v170_v34, 0.0  ;;  %v172_v36 = vpop.f32.mrb[1].mxu0 }
 0x13e   :  { %v176_v37 = vmax.f32 %v172_v36, 0.0 }
 0x13f   :  { %v177_v38 = vmin.f32 %v175_v35, 1.0 }
 0x140   :  { %v178_v39 = vmin.f32 %v176_v37, 1.0 }
 0x141   :  { %179 = vst [vmem:[#allocation7] sm:$0xff] %v177_v38 }
 0x142   :  { %180 = vst [vmem:[#allocation7 + $0x8] sm:$0xff] %v178_v39 }
 0x143   :  { %321 = shalt.err (!%p318_p6)
}
 0x144   :  { %s322_s10 = scalar_lea.hbm %s403_s2, 256 }
 0x145   :  { %p323_p7 = scmp.ne.s32.totalorder %s403_s2, %s322_s10  ;;  %p326_p8 = scmp.lt.u32.totalorder %s322_s10, %s403_s2 }
 0x147   :  { %p328_p9 = pnand %p326_p8, %p323_p7 }
 0x149   :  { %331 = shalt.err (!%p328_p9)
}
 0x14a   :  { %190 = dma.vmem_to_hbm [thread:$0]  %s188_s6, 256, %s403_s2, [#allocation4]  }
 0x14b   :  { %336 = dma.done.wait [#allocation4], 256  }
 0x14c   :  { %337 = vsyncadd [#allocation4], 4294967040 }
 0x14d   :  { %194 = vsyncpa [#allocation3], 1 }
 0x14e   :  { %195 = vsyncpa [#allocation6], 1 }
 0x14f   :  { %196 = vsyncpa [#allocation4], 1 }

</bundles_post_ra>
